<compile_context>
chip_gen: v6e
topology: v6e:2x2x1
jax: 0.10.0
libtpu: 0.0.40
codegen_flags: <defaults>
</compile_context>

<pallas_src>
import jax
import jax.numpy as jnp
from jax.experimental import pallas as pl
from jax.experimental.pallas import tpu as pltpu

_TILE_M_MAX = 4096                       # rows per grid step (upper cap)
_INPUT_VMEM_BUDGET = 16 * 1024 * 1024    # double-buffered descriptor tiles
_VMEM_LIMIT_BYTES = 32 * 1024 * 1024     # <= physical VMEM on v5e/v6e/v7x


def _round_up(x: int, m: int) -> int:
    return (x + m - 1) // m * m


def _pick_tile_m(M: int, D: int, in_itemsize: int, n_streams: int) -> int:
    """Row-tile size: VMEM-budgeted, lane-/sublane-friendly, load balanced."""
    if M <= 128:
        # Tiny problem: one resident tile, block == full row extent (no ragged
        # block, no padding). Output block equals the full array -> legal.
        return M
    per_row = D * in_itemsize * 2 * n_streams        # 2 = double buffering
    tile_m = max(128, _INPUT_VMEM_BUDGET // max(per_row, 1))
    # Never exceed the row extent (floor M to 128) and never exceed the cap.
    tile_m = min(tile_m, _TILE_M_MAX, (M // 128) * 128)
    if M >= 4 * 128:
        # Keep >= 4 grid steps so megacore / v7x 2-TC sharding has work.
        tile_m = min(tile_m, _round_up(pl.cdiv(M, 4), 128))
    return max(128, (tile_m // 128) * 128)


def _token_confidence_fused_kernel(x0_ref, x1_ref, w_ref, b_ref, o0_ref, o1_ref):
    # x*_ref: (tile_m, D) native dtype; w_ref: (1, D) f32 (resident);
    # b_ref: (1, 1) f32 in SMEM; o*_ref: (1, tile_m) lane-dense rows.
    w = w_ref[...]                                   # (1, D), broadcasts over rows
    b = b_ref[0, 0]                                  # scalar bias from SMEM
    x0 = x0_ref[...].astype(jnp.float32)             # compute in weight dtype (f32)
    x1 = x1_ref[...].astype(jnp.float32)
    l0 = jnp.sum(x0 * w, axis=-1, keepdims=True) + b  # VPU mul + XLU lane reduce
    l1 = jnp.sum(x1 * w, axis=-1, keepdims=True) + b
    # Column -> lane-dense row (XLU transpose), then unmasked vst.
    o0_ref[...] = jax.nn.sigmoid(l0).T.astype(o0_ref.dtype)
    o1_ref[...] = jax.nn.sigmoid(l1).T.astype(o1_ref.dtype)


def _token_confidence_single_kernel(x_ref, w_ref, b_ref, o_ref):
    w = w_ref[...]
    b = b_ref[0, 0]
    x = x_ref[...].astype(jnp.float32)
    logits = jnp.sum(x * w, axis=-1, keepdims=True) + b
    o_ref[...] = jax.nn.sigmoid(logits).T.astype(o_ref.dtype)


def _cost(M: int, D: int, in_dtype, out_dtype, n_streams: int) -> pl.CostEstimate:
    in_bytes = n_streams * M * D * jnp.dtype(in_dtype).itemsize
    out_bytes = n_streams * M * jnp.dtype(out_dtype).itemsize
    return pl.CostEstimate(
        flops=n_streams * 2 * M * D,
        transcendentals=n_streams * M,
        bytes_accessed=in_bytes + out_bytes + D * 4 + 4,
    )


def _apply_fused(desc0: jax.Array, desc1: jax.Array, w_row: jax.Array, b: jax.Array):
    out_dtype = desc0.dtype
    lead = desc0.shape[:-1]
    D = desc0.shape[-1]
    M = 1
    for s in lead:
        M *= s
    x0 = desc0.reshape(M, D)                          # metadata reshape, no HBM copy
    x1 = desc1.reshape(M, D)
    tile_m = _pick_tile_m(M, D, jnp.dtype(x0.dtype).itemsize, n_streams=2)
    num_tiles = pl.cdiv(M, tile_m)

    o0, o1 = pl.pallas_call(
        _token_confidence_fused_kernel,
        out_shape=(
            jax.ShapeDtypeStruct((num_tiles, tile_m), out_dtype),
            jax.ShapeDtypeStruct((num_tiles, tile_m), out_dtype),
        ),
        grid=(num_tiles,),
        in_specs=[
            pl.BlockSpec((tile_m, D), lambda i: (i, 0)),          # ragged last block OK
            pl.BlockSpec((tile_m, D), lambda i: (i, 0)),
            pl.BlockSpec((1, D), lambda i: (0, 0)),               # weight stays resident
            pl.BlockSpec(memory_space=pltpu.MemorySpace.SMEM),    # scalar bias
        ],
        out_specs=(
            pl.BlockSpec((1, tile_m), lambda i: (i, 0)),          # lane-dense rows
            pl.BlockSpec((1, tile_m), lambda i: (i, 0)),
        ),
        compiler_params=pltpu.CompilerParams(
            dimension_semantics=("parallel",),
            vmem_limit_bytes=_VMEM_LIMIT_BYTES,
        ),
        cost_estimate=_cost(M, D, x0.dtype, out_dtype, n_streams=2),
    )(x0, x1, w_row, b)

    return (
        o0.reshape(-1)[:M].reshape(lead),
        o1.reshape(-1)[:M].reshape(lead),
    )


def _apply_single(desc: jax.Array, w_row: jax.Array, b: jax.Array) -> jax.Array:
    out_dtype = desc.dtype
    lead = desc.shape[:-1]
    D = desc.shape[-1]
    M = 1
    for s in lead:
        M *= s
    x = desc.reshape(M, D)
    tile_m = _pick_tile_m(M, D, jnp.dtype(x.dtype).itemsize, n_streams=1)
    num_tiles = pl.cdiv(M, tile_m)

    out = pl.pallas_call(
        _token_confidence_single_kernel,
        out_shape=jax.ShapeDtypeStruct((num_tiles, tile_m), out_dtype),
        grid=(num_tiles,),
        in_specs=[
            pl.BlockSpec((tile_m, D), lambda i: (i, 0)),
            pl.BlockSpec((1, D), lambda i: (0, 0)),
            pl.BlockSpec(memory_space=pltpu.MemorySpace.SMEM),
        ],
        out_specs=pl.BlockSpec((1, tile_m), lambda i: (i, 0)),
        compiler_params=pltpu.CompilerParams(
            dimension_semantics=("parallel",),
            vmem_limit_bytes=_VMEM_LIMIT_BYTES,
        ),
        cost_estimate=_cost(M, D, x.dtype, out_dtype, n_streams=1),
    )(x, w_row, b)

    return out.reshape(-1)[:M].reshape(lead)


class TokenConfidence:
    """JAX/Pallas port of kornia.feature.lightglue.TokenConfidence."""

    def __init__(self, dim: int, key: jax.Array) -> None:
        # nn.Linear(dim, 1): weight (1, dim), bias (1,), uniform(-1/sqrt(dim), 1/sqrt(dim)).
        kw, kb = jax.random.split(key)
        bound = 1.0 / (dim ** 0.5)
        self.weight = jax.random.uniform(
            kw, (1, dim), dtype=jnp.float32, minval=-bound, maxval=bound
        )  # lane-dense (1, D) row for the kernel
        self.bias = jax.random.uniform(
            kb, (1, 1), dtype=jnp.float32, minval=-bound, maxval=bound
        )  # (1, 1) scalar, lives in SMEM inside the kernel

    def __call__(self, desc0: jax.Array, desc1: jax.Array):
        if desc0.shape == desc1.shape and desc0.dtype == desc1.dtype:
            return _apply_fused(desc0, desc1, self.weight, self.bias)
        # Fallback when the two descriptor sets differ in shape/dtype.
        return (
            _apply_single(desc0, self.weight, self.bias),
            _apply_single(desc1, self.weight, self.bias),
        )


def _reference(desc, weight, bias):
    logits = jnp.einsum(
        "...d,d->...", desc.astype(jnp.float32), weight[0].astype(jnp.float32)
    ) + bias[0, 0]
    return jax.nn.sigmoid(logits).astype(desc.dtype)


if __name__ == "__main__":
    key = jax.random.PRNGKey(0)
    k_params, k0, k1, k2, k3, k4 = jax.random.split(key, 6)

    B, N, D = 2, 8, 32  # small shapes: batch=2, tokens=8, hidden dim=32
    module = TokenConfidence(D, k_params)

    desc0 = jax.random.normal(k0, (B, N, D), dtype=jnp.float32)
    desc1 = jax.random.normal(k1, (B, N, D), dtype=jnp.float32)

    # 1) Fused path, single resident tile (M <= 128).
    conf0, conf1 = module(desc0, desc1)
    jax.block_until_ready((conf0, conf1))
    ref0 = _reference(desc0, module.weight, module.bias)
    ref1 = _reference(desc1, module.weight, module.bias)
    assert conf0.shape == (B, N) and conf1.shape == (B, N)
    assert jnp.allclose(conf0, ref0, atol=1e-5)
    assert jnp.allclose(conf1, ref1, atol=1e-5)

    # 2) Fallback path (mismatched shapes -> per-descriptor calls).
    desc2 = jax.random.normal(k2, (B, 6, D), dtype=jnp.float32)
    conf0b, conf2 = module(desc0, desc2)
    jax.block_until_ready((conf0b, conf2))
    assert conf2.shape == (B, 6)
    assert jnp.allclose(conf0b, ref0, atol=1e-5)
    assert jnp.allclose(conf2, _reference(desc2, module.weight, module.bias), atol=1e-5)

    # 3) Fused path with a ragged last block (M = 200, tile_m = 128, 2 tiles):
    #    exercises the no-pad boundary handling on both input and output.
    desc3 = jax.random.normal(k3, (B, 100, D), dtype=jnp.float32)
    desc4 = jax.random.normal(k4, (B, 100, D), dtype=jnp.float32)
    conf3, conf4 = module(desc3, desc4)
    jax.block_until_ready((conf3, conf4))
    assert conf3.shape == (B, 100) and conf4.shape == (B, 100)
    assert jnp.allclose(conf3, _reference(desc3, module.weight, module.bias), atol=1e-5)
    assert jnp.allclose(conf4, _reference(desc4, module.weight, module.bias), atol=1e-5)

    print("KERNEL_OK")
</pallas_src>

<mosaic_0001>
module attributes {stable_mosaic.version = 11 : i64} {
  func.func @_token_confidence_fused_kernel(%arg0: i32, %arg1: memref<16x32xf32, #tpu.memory_space<vmem>>, %arg2: memref<16x32xf32, #tpu.memory_space<vmem>>, %arg3: memref<1x32xf32, #tpu.memory_space<vmem>>, %arg4: memref<1x1xf32, #tpu.memory_space<smem>>, %arg5: memref<1x16xf32, #tpu.memory_space<vmem>>, %arg6: memref<1x16xf32, #tpu.memory_space<vmem>>) attributes {dimension_semantics = [#tpu.dimension_semantics<parallel>], iteration_bounds = array<i64: 1>, scalar_prefetch = 0 : i64, scratch_operands = 0 : i64, tpu.core_type = #tpu.core_type<tc>, window_params = [{transform_indices = @transform_0, window_bounds = array<i64: 16, 32>}, {transform_indices = @transform_1, window_bounds = array<i64: 16, 32>}, {pipeline_mode = #tpu.pipeline_mode<synchronous>, transform_indices = @transform_2, window_bounds = array<i64: 1, 32>}, {transform_indices = @transform_3, window_bounds = array<i64: 1, 1>}, {transform_indices = @transform_4, window_bounds = array<i64: 1, 16>}, {transform_indices = @transform_5, window_bounds = array<i64: 1, 16>}]} {
    %c0 = arith.constant 0 : index
    %c0_0 = arith.constant 0 : index
    %0 = vector.load %arg3[%c0, %c0_0] : memref<1x32xf32, #tpu.memory_space<vmem>>, vector<1x32xf32>
    %c0_1 = arith.constant 0 : index
    %c0_2 = arith.constant 0 : index
    %1 = memref.load %arg4[%c0_1, %c0_2] : memref<1x1xf32, #tpu.memory_space<smem>>
    %c0_3 = arith.constant 0 : index
    %c0_4 = arith.constant 0 : index
    %2 = vector.load %arg1[%c0_3, %c0_4] : memref<16x32xf32, #tpu.memory_space<vmem>>, vector<16x32xf32>
    %c0_5 = arith.constant 0 : index
    %c0_6 = arith.constant 0 : index
    %3 = vector.load %arg2[%c0_5, %c0_6] : memref<16x32xf32, #tpu.memory_space<vmem>>, vector<16x32xf32>
    %4 = vector.broadcast %0 : vector<1x32xf32> to vector<16x32xf32>
    %5 = arith.mulf %2, %4 : vector<16x32xf32>
    %cst = arith.constant dense<0.000000e+00> : vector<16xf32>
    %6 = vector.multi_reduction <add>, %5, %cst [1] : vector<16x32xf32> to vector<16xf32>
    %7 = vector.shape_cast %6 : vector<16xf32> to vector<16x1xf32>
    %8 = vector.broadcast %1 : f32 to vector<16x1xf32>
    %9 = arith.addf %7, %8 : vector<16x1xf32>
    %10 = vector.broadcast %0 : vector<1x32xf32> to vector<16x32xf32>
    %11 = arith.mulf %3, %10 : vector<16x32xf32>
    %cst_7 = arith.constant dense<0.000000e+00> : vector<16xf32>
    %12 = vector.multi_reduction <add>, %11, %cst_7 [1] : vector<16x32xf32> to vector<16xf32>
    %13 = vector.shape_cast %12 : vector<16xf32> to vector<16x1xf32>
    %14 = vector.broadcast %1 : f32 to vector<16x1xf32>
    %15 = arith.addf %13, %14 : vector<16x1xf32>
    %16 = arith.negf %9 : vector<16x1xf32>
    %17 = math.exp %16 : vector<16x1xf32>
    %cst_8 = arith.constant 1.000000e+00 : f32
    %18 = vector.broadcast %cst_8 : f32 to vector<16x1xf32>
    %19 = arith.addf %18, %17 : vector<16x1xf32>
    %20 = arith.divf %18, %19 : vector<16x1xf32>
    %21 = tpu.transpose %20, [1, 0] : vector<16x1xf32> -> vector<1x16xf32>
    %c0_9 = arith.constant 0 : index
    %c0_10 = arith.constant 0 : index
    %22 = vector.load %arg5[%c0_9, %c0_10] : memref<1x16xf32, #tpu.memory_space<vmem>>, vector<1x16xf32>
    tpu.vector_store %arg5[%c0_9, %c0_10], %21 {strides = array<i32>} : memref<1x16xf32, #tpu.memory_space<vmem>>, vector<1x16xf32>,
    %23 = arith.negf %15 : vector<16x1xf32>
    %24 = math.exp %23 : vector<16x1xf32>
    %cst_11 = arith.constant 1.000000e+00 : f32
    %25 = vector.broadcast %cst_11 : f32 to vector<16x1xf32>
    %26 = arith.addf %25, %24 : vector<16x1xf32>
    %27 = arith.divf %25, %26 : vector<16x1xf32>
    %28 = tpu.transpose %27, [1, 0] : vector<16x1xf32> -> vector<1x16xf32>
    %c0_12 = arith.constant 0 : index
    %c0_13 = arith.constant 0 : index
    %29 = vector.load %arg6[%c0_12, %c0_13] : memref<1x16xf32, #tpu.memory_space<vmem>>, vector<1x16xf32>
    tpu.vector_store %arg6[%c0_12, %c0_13], %28 {strides = array<i32>} : memref<1x16xf32, #tpu.memory_space<vmem>>, vector<1x16xf32>,
    return
  }
  func.func @transform_0(%arg0: i32) -> (i32, i32) {
    %c0_i32 = arith.constant 0 : i32
    %c0_i32_0 = arith.constant 0 : i32
    return %arg0, %c0_i32 : i32, i32
  }
  func.func @transform_1(%arg0: i32) -> (i32, i32) {
    %c0_i32 = arith.constant 0 : i32
    %c0_i32_0 = arith.constant 0 : i32
    return %arg0, %c0_i32 : i32, i32
  }
  func.func @transform_2(%arg0: i32) -> (i32, i32) {
    %c0_i32 = arith.constant 0 : i32
    %c0_i32_0 = arith.constant 0 : i32
    %c0_i32_1 = arith.constant 0 : i32
    return %c0_i32, %c0_i32_0 : i32, i32
  }
  func.func @transform_3(%arg0: i32) -> (i32, i32) {
    %c0_i32 = arith.constant 0 : i32
    %c0_i32_0 = arith.constant 0 : i32
    %c0_i32_1 = arith.constant 0 : i32
    return %c0_i32, %c0_i32_0 : i32, i32
  }
  func.func @transform_4(%arg0: i32) -> (i32, i32) {
    %c0_i32 = arith.constant 0 : i32
    %c0_i32_0 = arith.constant 0 : i32
    return %arg0, %c0_i32 : i32, i32
  }
  func.func @transform_5(%arg0: i32) -> (i32, i32) {
    %c0_i32 = arith.constant 0 : i32
    %c0_i32_0 = arith.constant 0 : i32
    return %arg0, %c0_i32 : i32, i32
  }
}

</mosaic_0001>

<bundles_post_ra>
// kernel: tpu_custom_call.1
= control target key start
LH: loop header
LB: loop body
LE: loop exit
PB: predicated region body
PF: predicated region fallthrough
CT: control target
= control target key end

     0   :  { %12 = vsyncpa [#allocation4], 0  ;;  %s377_s0 = inlined_call_operand.hbm [shape: f32[16,32], index: 0, kind: input, shape index: {}]   ;;  %s378_s1 = inlined_call_operand.hbm [shape: f32[16,32], index: 1, kind: input, shape index: {}]   ;;  %s379_s2 = inlined_call_operand.vmem [shape: f32[1,32], index: 2, kind: input, shape index: {}]   ;;  %s380_s3 = inlined_call_operand.<no memory space> [shape: f32[1,1], index: 3, kind: input, shape index: {}]   ;;  %s381_s4 = inlined_call_operand.hbm [shape: f32[1,16], index: 4, kind: output, shape index: {0}]   ;;  %s382_s5 = inlined_call_operand.hbm [shape: f32[1,16], index: 5, kind: output, shape index: {1}]  }
   0x1   :  { %13 = vsyncpa [#allocation7], 0 }
   0x2   :  { %14 = vsyncpa [#allocation5], 0 }
   0x3   :  { %15 = vsyncpa [#allocation10], 0  ;;  %s321_s18 = smov [#allocation3]  }
   0x4   :  { %s21_s19 = sshll.u32 %s321_s18, 4  ;;  %s22_s19 = int_to_ptr.vmem [resolvable:$true] %s21_s19 }
   0x5   :  { %s241_s20 = scalar_lea.vmem %s22_s19, 256  ;;  %p246_p1 = scmp.lt.s32.totalorder %s22_s19, %s22_s19 }
   0x6   :  { %p242_p0 = scmp.ne.s32.totalorder %s22_s19, %s241_s20  ;;  %p247_p2 = scmp.lt.s32.totalorder %s241_s20, %s241_s20 }
   0x8   :  { %p248_p3 = por %p247_p2, %p246_p1 }
   0xa   :  { %p249_p4 = pnand %p248_p3, %p242_p0 }
   0xc   :  { %252 = shalt.err (!%p249_p4)
}
   0xd   :  { %s322_s21 = smov 128   ;;  %s323_s22 = smov 8  }
   0xe   :  { %27 = dma.hbm_to_vmem [thread:$0]  %s377_s0, 256, %s22_s19, [#allocation4], %s322_s21, %s322_s21, %s323_s22  }
   0xf   :  { %s324_s25 = smov [#allocation6]  }
  0x10   :  { %s33_s26 = sshll.u32 %s324_s25, 4  ;;  %s34_s26 = int_to_ptr.vmem [resolvable:$true] %s33_s26 }
  0x11   :  { %s261_s27 = scalar_lea.vmem %s34_s26, 256  ;;  %p266_p6 = scmp.lt.s32.totalorder %s34_s26, %s34_s26 }
  0x12   :  { %p262_p5 = scmp.ne.s32.totalorder %s34_s26, %s261_s27  ;;  %p267_p7 = scmp.lt.s32.totalorder %s261_s27, %s261_s27 }
  0x14   :  { %p268_p8 = por %p267_p7, %p266_p6 }
  0x16   :  { %p269_p9 = pnand %p268_p8, %p262_p5 }
  0x18   :  { %272 = shalt.err (!%p269_p9)
}
  0x19   :  { %39 = dma.hbm_to_vmem [thread:$0]  %s378_s1, 256, %s34_s26, [#allocation7], %s322_s21, %s322_s21, %s323_s22  }
  0x1a   :  { %313 = dma.done.wait [#allocation4], 256  }
  0x1b   :  { %314 = vsyncadd [#allocation4], 4294967040 }
  0x1c   :  { %315 = dma.done.wait [#allocation7], 256  }
  0x1d   :  { %316 = vsyncadd [#allocation7], 4294967040  ;;  %v205_v0 = vld [vmem:[%s379_s2] ss:$0 sm:$0xff]  ;;  %vm64_vm0 = vcmask 261120   ;;  %v53_v2 = vld [vmem:[#allocation3 + $0x8] sm:$0xff]  ;;  %v71_v13 = vstv %s380_s3 }
  0x1e   :  { %v52_v1 = vld [vmem:[#allocation3] sm:$0xff]  ;;  %v63_v4 = vmul.f32 %v205_v0, %v53_v2  ;;  %v54_v5 = vld [vmem:[#allocation6] sm:$0xff]  ;;  %v55_v6 = vld [vmem:[#allocation6 + $0x8] sm:$0xff]  ;;  %s325_s2 = smov [#allocation8]   ;;  %vm128_vm1 = vcmask 122880   ;;  %s326_s7 = smov [#allocation9]  }
  0x1f   :  { %v62_v3 = vmul.f32 %v205_v0, %v52_v1  ;;  %v74_v7 = vmul.f32 %v205_v0, %v54_v5  ;;  %v75_v8 = vmul.f32 %v205_v0, %v55_v6  ;;  %s181_s3 = sshll.u32 %s325_s2, 4  ;;  %s191_s8 = sshll.u32 %s326_s7, 4  ;;  %s182_s3 = int_to_ptr.vmem [resolvable:$true] %s181_s3  ;;  %s192_s8 = int_to_ptr.vmem [resolvable:$true] %s191_s8 }
  0x20   :  { %v68_v10 = vsel %vm64_vm0, %v63_v4, 0.0  ;;  %s273_s9 = scalar_lea.vmem %s182_s3, 16  ;;  %s277_s10 = scalar_lea.vmem %s182_s3, 32 }
  0x21   :  { %v65_v9 = vsel %vm64_vm0, %v62_v3, 0.0  ;;  %69 = vadd.xlane.f32.xlu1 %v68_v10  ;;  %v76_v11 = vsel %vm64_vm0, %v74_v7, 0.0  ;;  %v79_v12 = vsel %vm64_vm0, %v75_v8, 0.0  ;;  %p274_p10 = scmp.ne.s32.totalorder %s182_s3, %s273_s9  ;;  %p278_p11 = scmp.lt.s32.totalorder %s182_s3, %s182_s3 }
  0x22   :  { %66 = vadd.xlane.f32.xlu0 %v65_v9  ;;  %p279_p12 = scmp.lt.s32.totalorder %s277_s10, %s273_s9 }
  0x24   :  { %p280_p13 = por %p279_p12, %p278_p11 }
  0x25   :  { %80 = vadd.xlane.f32.xlu1 %v79_v12 }
  0x26   :  { %77 = vadd.xlane.f32.xlu0 %v76_v11  ;;  %p281_p0 = pnand %p280_p13, %p274_p10 }
  0xaa   :  { %v70_v15 = vpop.xlane.xlu1 %69 }
  0xab   :  { %v67_v14 = vpop.xlane.xlu0 %66  ;;  %v73_v17 = vadd.f32 %v71_v13, %v70_v15 }
  0xac   :  { %v72_v16 = vadd.f32 %v71_v13, %v67_v14 }
  0xad   :  { %v207_v19 = vmul.f32 -1.442695, %v73_v17 }
  0xae   :  { %v206_v18 = vmul.f32 -1.442695, %v72_v16  ;;  %v81_v21 = vpop.xlane.xlu1 %80 }
  0xaf   :  { %v78_v20 = vpop.xlane.xlu0 %77  ;;  %v83_v23 = vadd.f32 %v81_v21, %v71_v13 }
  0xb0   :  { %217 = vpow2.f32 %v206_v18  ;;  %v82_v22 = vadd.f32 %v78_v20, %v71_v13 }
  0xb1   :  { %219 = vpow2.f32 %v207_v19  ;;  %v209_v25 = vmul.f32 -1.442695, %v83_v23 }
  0xb2   :  { %v208_v24 = vmul.f32 -1.442695, %v82_v22 }
  0xb4   :  { %221 = vpow2.f32 %v208_v24 }
  0xb5   :  { %223 = vpow2.f32 %v209_v25 }
  0xbd   :  { %v218_v26 = vpop.eup %217 }
  0xbe   :  { %v220_v27 = vpop.eup %219  ;;  %v90_v28 = vadd.f32 1.0, %v218_v26 }
  0xbf   :  { %v91_v29 = vadd.f32 1.0, %v220_v27 }
  0xc0   :  { %225 = vrcp.f32 %v90_v28 }
  0xc1   :  { %v222_v30 = vpop.eup %221  ;;  %227 = vrcp.f32 %v91_v29 }
  0xc2   :  { %v224_v31 = vpop.eup %223  ;;  %v136_v32 = vadd.f32 1.0, %v222_v30 }
  0xc3   :  { %v137_v33 = vadd.f32 1.0, %v224_v31 }
  0xc4   :  { %229 = vrcp.f32 %v136_v32 }
  0xc5   :  { %231 = vrcp.f32 %v137_v33 }
  0xcd   :  { %v226_v34 = vpop.eup %225 }
  0xce   :  { %96 = vxpose.xlu0.b32.start [1/2] (short) (narrow) %v226_v34, 8  ;;  %v228_v35 = vpop.eup %227 }
  0xd1   :  { %v230_v36 = vpop.eup %229 }
  0xd2   :  { %97 = vxpose.xlu0.b32.end [2/2] (short) (narrow) %v228_v35, 8  ;;  %142 = vxpose.xlu1.b32.start [1/2] (short) (narrow) %v230_v36, 8  ;;  %v232_v37 = vpop.eup %231 }
  0xd6   :  { %143 = vxpose.xlu1.b32.end [2/2] (short) (narrow) %v232_v37, 8 }
 0x14a   :  { %v112_v38 = vpop.trf.xlu0 }
 0x14b   :  { %129 = vst.msk [vmem:[#allocation8] sm:$0x1] %vm128_vm1, %v112_v38 }
 0x14c   :  { %284 = shalt.err (!%p281_p0)
}
 0x14d   :  { %184 = dma.vmem_to_hbm [thread:$0]  %s182_s3, 16, %s381_s4, [#allocation5]  }
 0x14e   :  { %v158_v39 = vpop.trf.xlu1  ;;  %s293_s13 = scalar_lea.vmem %s192_s8, 16  ;;  %s297_s14 = scalar_lea.vmem %s192_s8, 32 }
 0x14f   :  { %174 = vst.msk [vmem:[#allocation9] sm:$0x1] %vm128_vm1, %v158_v39  ;;  %p294_p1 = scmp.ne.s32.totalorder %s192_s8, %s293_s13  ;;  %p298_p2 = scmp.lt.s32.totalorder %s192_s8, %s192_s8 }
 0x150   :  { %p299_p3 = scmp.lt.s32.totalorder %s297_s14, %s293_s13 }
 0x152   :  { %p300_p4 = por %p299_p3, %p298_p2 }
 0x154   :  { %p301_p5 = pnand %p300_p4, %p294_p1 }
 0x156   :  { %304 = shalt.err (!%p301_p5)
}
 0x157   :  { %194 = dma.vmem_to_hbm [thread:$0]  %s192_s8, 16, %s382_s5, [#allocation10]  }
 0x158   :  { %317 = dma.done.wait [#allocation5], 16  }
 0x159   :  { %318 = vsyncadd [#allocation5], 4294967280 }
 0x15a   :  { %319 = dma.done.wait [#allocation10], 16  }
 0x15b   :  { %320 = vsyncadd [#allocation10], 4294967280 }
 0x15c   :  { %201 = vsyncpa [#allocation4], 1 }
 0x15d   :  { %202 = vsyncpa [#allocation7], 1 }
 0x15e   :  { %203 = vsyncpa [#allocation5], 1 }
 0x15f   :  { %204 = vsyncpa [#allocation10], 1 }

</bundles_post_ra>
